<compile_context>
chip_gen: v5e
topology: v5e:2x2
jax: 0.10.0
libtpu: 0.0.40
codegen_flags: <defaults>
</compile_context>

<pallas_src>
import jax
import jax.numpy as jnp
from jax import lax
from jax.experimental import pallas as pl
from jax.experimental.pallas import tpu as pltpu


# ---------------------------------------------------------------------------
# Pallas kernel
# ---------------------------------------------------------------------------
def _attn_kernel(x_ref, wq_ref, wk_ref, wv_ref, bq_ref, bv_ref, bias_ref,
                 wp_ref, bp_ref, o_ref, acc_ref):
    h = pl.program_id(1)

    @pl.when(h == 0)
    def _():
        acc_ref[...] = jnp.zeros_like(acc_ref)

    x = x_ref[0]                                                   # (N, C)

    # Per-head projections (scale & q_bias already folded into wq/bq).
    q = jnp.dot(x, wq_ref[0], preferred_element_type=jnp.float32) + bq_ref[0]
    k = jnp.dot(x, wk_ref[0], preferred_element_type=jnp.float32)
    v = jnp.dot(x, wv_ref[0], preferred_element_type=jnp.float32) + bv_ref[0]

    # Attention logits: contract head_dim of q with head_dim of k
    # (RHS-transposed matmul -> no in-kernel transpose copy).
    s = lax.dot_general(q, k, (((1,), (1,)), ((), ())),
                        preferred_element_type=jnp.float32)        # (N, N)
    s = s + bias_ref[0]                                            # rel-pos bias

    # Numerically stable softmax over the key axis.
    m = jnp.max(s, axis=-1, keepdims=True)
    p = jnp.exp(s - m)
    denom = jnp.sum(p, axis=-1, keepdims=True)
    attn = p / denom

    head_out = jnp.dot(attn, v, preferred_element_type=jnp.float32)   # (N, hd)

    # Fold the per-head output projection into the head reduction.
    acc_ref[...] += jnp.dot(head_out, wp_ref[0],
                            preferred_element_type=jnp.float32)       # (N, C)

    @pl.when(h == pl.num_programs(1) - 1)
    def _():
        o_ref[0] = (acc_ref[...] + bp_ref[...]).astype(o_ref.dtype)


def eva_attention_pallas(x, wq, wk, wv, bq, bv, bias, wp, bp):
    B, N, C = x.shape
    H, _, hd = wq.shape

    flops = 2 * B * H * N * (3 * C * hd + 2 * N * hd + hd * C)
    cost = pl.CostEstimate(
        flops=flops,
        transcendentals=B * H * N * N,
        bytes_accessed=4 * (2 * B * N * C + 4 * H * C * hd + H * N * N
                            + 2 * H * hd + C),
    )

    return pl.pallas_call(
        _attn_kernel,
        out_shape=jax.ShapeDtypeStruct((B, N, C), x.dtype),
        grid_spec=pltpu.PrefetchScalarGridSpec(
            num_scalar_prefetch=0,
            grid=(B, H),                       # head axis last = reduction
            in_specs=[
                pl.BlockSpec((1, N, C), lambda b, h: (b, 0, 0)),   # x (resident over h)
                pl.BlockSpec((1, C, hd), lambda b, h: (h, 0, 0)),  # wq (scale folded)
                pl.BlockSpec((1, C, hd), lambda b, h: (h, 0, 0)),  # wk
                pl.BlockSpec((1, C, hd), lambda b, h: (h, 0, 0)),  # wv
                pl.BlockSpec((1, 1, hd), lambda b, h: (h, 0, 0)),  # bq (scale folded)
                pl.BlockSpec((1, 1, hd), lambda b, h: (h, 0, 0)),  # bv
                pl.BlockSpec((1, N, N), lambda b, h: (h, 0, 0)),   # rel-pos bias
                pl.BlockSpec((1, hd, C), lambda b, h: (h, 0, 0)),  # per-head proj weight
                pl.BlockSpec((1, C), lambda b, h: (0, 0)),         # proj bias
            ],
            out_specs=pl.BlockSpec((1, N, C), lambda b, h: (b, 0, 0)),
            scratch_shapes=[pltpu.VMEM((N, C), jnp.float32)],
        ),
        compiler_params=pltpu.CompilerParams(
            dimension_semantics=("parallel", "arbitrary")),
        cost_estimate=cost,
    )(x, wq, wk, wv, bq, bv, bias, wp, bp)


# ---------------------------------------------------------------------------
# Wrapper: mirrors the PyTorch module's parameterization, does the exact
# algebraic folds once on the host-side graph (weights only, no activations).
# ---------------------------------------------------------------------------
def make_relative_position_index(window_size):
    Wh, Ww = window_size
    coords = jnp.stack(jnp.meshgrid(jnp.arange(Wh), jnp.arange(Ww),
                                    indexing="ij"))                 # (2, Wh, Ww)
    coords_flat = coords.reshape(2, -1)                             # (2, M)
    rel = coords_flat[:, :, None] - coords_flat[:, None, :]         # (2, M, M)
    rel = jnp.transpose(rel, (1, 2, 0)).astype(jnp.int32)           # (M, M, 2)
    rel = rel.at[:, :, 0].add(Wh - 1)
    rel = rel.at[:, :, 1].add(Ww - 1)
    rel = rel.at[:, :, 0].multiply(2 * Ww - 1)
    num_rel = (2 * Wh - 1) * (2 * Ww - 1) + 3
    M = Wh * Ww
    idx = jnp.zeros((M + 1, M + 1), dtype=jnp.int32)
    idx = idx.at[1:, 1:].set(rel.sum(-1))
    idx = idx.at[0, :].set(num_rel - 3)
    idx = idx.at[:, 0].set(num_rel - 2)
    idx = idx.at[0, 0].set(num_rel - 1)
    return idx


def eva_attention(x, params, rel_pos_bias=None):
    """x: (B, N, C). Returns (B, N, C), matching Attention.forward."""
    B, N, C = x.shape
    H = params["num_heads"]
    w_qkv = params["qkv_weight"]                         # (3*D, C) nn.Linear layout
    D = w_qkv.shape[0] // 3
    hd = D // H
    scale = params.get("qk_scale") or hd ** (-0.5)

    # x @ Wqkv.T layout, split per (q/k/v, head).  Fold the qk scale into q.
    wt = w_qkv.T.reshape(C, 3, H, hd)
    wq = jnp.transpose(wt[:, 0], (1, 0, 2)) * scale       # (H, C, hd)
    wk = jnp.transpose(wt[:, 1], (1, 0, 2))
    wv = jnp.transpose(wt[:, 2], (1, 0, 2))

    if params.get("q_bias") is not None:
        bq = (params["q_bias"] * scale).reshape(H, 1, hd)
        bv = params["v_bias"].reshape(H, 1, hd)
    else:
        bq = jnp.zeros((H, 1, hd), x.dtype)
        bv = jnp.zeros((H, 1, hd), x.dtype)

    # Relative-position bias: parameter-only gather, done once here.
    bias = jnp.zeros((H, N, N), jnp.float32)
    if params.get("rel_pos_table") is not None:
        idx = params["rel_pos_index"].reshape(-1)
        rpb = params["rel_pos_table"][idx].reshape(N, N, H)
        bias = bias + jnp.transpose(rpb, (2, 0, 1))
    if rel_pos_bias is not None:
        # TODO(synk): batch-varying rel_pos_bias not supported (EVA shares it).
        bias = bias + rel_pos_bias.astype(jnp.float32)

    wp = params["proj_weight"].T.reshape(H, hd, C)         # (H, hd, C)
    bp = params["proj_bias"].reshape(1, C)

    return eva_attention_pallas(x, wq, wk, wv, bq, bv, bias, wp, bp)


# ---------------------------------------------------------------------------
# Pure-JAX reference (direct transcription of the PyTorch forward)
# ---------------------------------------------------------------------------
def eva_attention_reference(x, params, rel_pos_bias=None):
    B, N, C = x.shape
    H = params["num_heads"]
    w_qkv = params["qkv_weight"]
    D = w_qkv.shape[0] // 3
    hd = D // H
    scale = params.get("qk_scale") or hd ** (-0.5)

    if params.get("q_bias") is not None:
        qkv_bias = jnp.concatenate([params["q_bias"],
                                    jnp.zeros_like(params["v_bias"]),
                                    params["v_bias"]])
    else:
        qkv_bias = jnp.zeros((3 * D,), x.dtype)

    qkv = jnp.einsum("bnc,dc->bnd", x, w_qkv, precision="highest") + qkv_bias
    qkv = qkv.reshape(B, N, 3, H, hd).transpose(2, 0, 3, 1, 4)
    q, k, v = qkv[0] * scale, qkv[1], qkv[2]

    attn = jnp.einsum("bhqd,bhkd->bhqk", q, k, precision="highest")
    if params.get("rel_pos_table") is not None:
        idx = params["rel_pos_index"].reshape(-1)
        rpb = params["rel_pos_table"][idx].reshape(N, N, H).transpose(2, 0, 1)
        attn = attn + rpb[None]
    if rel_pos_bias is not None:
        attn = attn + rel_pos_bias
    attn = jax.nn.softmax(attn, axis=-1)

    out = jnp.einsum("bhqk,bhkd->bhqd", attn, v, precision="highest")
    out = out.transpose(0, 2, 1, 3).reshape(B, N, D)
    out = jnp.einsum("bnd,cd->bnc", out, params["proj_weight"],
                     precision="highest")
    return out + params["proj_bias"]


# ---------------------------------------------------------------------------
if __name__ == "__main__":
    num_heads = 4
    head_dim = 16
    dim = num_heads * head_dim                  # 64
    window = (4, 4)
    N = window[0] * window[1] + 1               # 17 (cls token + 16 patches)
    B = 2
    D = dim                                     # all_head_dim
    num_rel = (2 * window[0] - 1) * (2 * window[1] - 1) + 3

    key = jax.random.PRNGKey(0)
    ks = jax.random.split(key, 8)
    f32 = jnp.float32

    x = jax.random.normal(ks[0], (B, N, dim), dtype=f32)
    params = {
        "num_heads": num_heads,
        "qk_scale": None,
        # nn.Linear(dim, 3*all_head_dim, bias=False) weight: (3*D, C)
        "qkv_weight": 0.05 * jax.random.normal(ks[1], (3 * D, dim), dtype=f32),
        # qkv_bias=True path: q_bias / v_bias (k bias is implicitly zero)
        "q_bias": 0.05 * jax.random.normal(ks[2], (D,), dtype=f32),
        "v_bias": 0.05 * jax.random.normal(ks[3], (D,), dtype=f32),
        # nn.Linear(all_head_dim, dim) weight: (C, D)
        "proj_weight": 0.05 * jax.random.normal(ks[4], (dim, D), dtype=f32),
        "proj_bias": 0.05 * jax.random.normal(ks[5], (dim,), dtype=f32),
        # window-size relative position bias table + index buffer
        "rel_pos_table": 0.05 * jax.random.normal(ks[6], (num_rel, num_heads),
                                                  dtype=f32),
        "rel_pos_index": make_relative_position_index(window),
    }

    out = jax.block_until_ready(eva_attention(x, params))
    ref = jax.block_until_ready(eva_attention_reference(x, params))

    assert out.shape == (B, N, dim)
    max_err = float(jnp.max(jnp.abs(out - ref)))
    assert jnp.allclose(out, ref, rtol=1e-3, atol=1e-3), max_err
    print("KERNEL_OK")
</pallas_src>

<mosaic_0001>
module attributes {stable_mosaic.version = 11 : i64} {
  func.func @_attn_kernel(%arg0: i32, %arg1: i32, %arg2: memref<1x17x64xf32, #tpu.memory_space<vmem>>, %arg3: memref<1x64x16xf32, #tpu.memory_space<vmem>>, %arg4: memref<1x64x16xf32, #tpu.memory_space<vmem>>, %arg5: memref<1x64x16xf32, #tpu.memory_space<vmem>>, %arg6: memref<1x1x16xf32, #tpu.memory_space<vmem>>, %arg7: memref<1x1x16xf32, #tpu.memory_space<vmem>>, %arg8: memref<1x17x17xf32, #tpu.memory_space<vmem>>, %arg9: memref<1x16x64xf32, #tpu.memory_space<vmem>>, %arg10: memref<1x64xf32, #tpu.memory_space<vmem>>, %arg11: memref<1x17x64xf32, #tpu.memory_space<vmem>>, %arg12: memref<17x64xf32, #tpu.memory_space<vmem>>) attributes {dimension_semantics = [#tpu.dimension_semantics<parallel>, #tpu.dimension_semantics<arbitrary>], iteration_bounds = array<i64: 2, 4>, scalar_prefetch = 0 : i64, scratch_operands = 1 : i64, tpu.core_type = #tpu.core_type<tc>, window_params = [{transform_indices = @transform_0, window_bounds = array<i64: 1, 17, 64>}, {transform_indices = @transform_1, window_bounds = array<i64: 1, 64, 16>}, {transform_indices = @transform_2, window_bounds = array<i64: 1, 64, 16>}, {transform_indices = @transform_3, window_bounds = array<i64: 1, 64, 16>}, {transform_indices = @transform_4, window_bounds = array<i64: 1, 1, 16>}, {transform_indices = @transform_5, window_bounds = array<i64: 1, 1, 16>}, {transform_indices = @transform_6, window_bounds = array<i64: 1, 17, 17>}, {transform_indices = @transform_7, window_bounds = array<i64: 1, 16, 64>}, {pipeline_mode = #tpu.pipeline_mode<synchronous>, transform_indices = @transform_8, window_bounds = array<i64: 1, 64>}, {transform_indices = @transform_9, window_bounds = array<i64: 1, 17, 64>}]} {
    %c0_i32 = arith.constant 0 : i32
    %0 = arith.cmpi eq, %arg1, %c0_i32 : i32
    %1 = arith.extui %0 : i1 to i32
    %c0_i32_0 = arith.constant 0 : i32
    %2 = arith.cmpi ne, %1, %c0_i32_0 : i32
    scf.if %2 {
      %cst_36 = arith.constant 0.000000e+00 : f32
      %45 = vector.broadcast %cst_36 : f32 to vector<17x64xf32>
      %c0_37 = arith.constant 0 : index
      %c0_38 = arith.constant 0 : index
      %46 = vector.load %arg12[%c0_37, %c0_38] : memref<17x64xf32, #tpu.memory_space<vmem>>, vector<17x64xf32>
      tpu.vector_store %arg12[%c0_37, %c0_38], %45 {strides = array<i32>} : memref<17x64xf32, #tpu.memory_space<vmem>>, vector<17x64xf32>,
    } else {
    }
    %c0 = arith.constant 0 : index
    %c0_1 = arith.constant 0 : index
    %c0_2 = arith.constant 0 : index
    %3 = vector.load %arg2[%c0, %c0_1, %c0_2] : memref<1x17x64xf32, #tpu.memory_space<vmem>>, vector<1x17x64xf32>
    %4 = vector.shape_cast %3 : vector<1x17x64xf32> to vector<17x64xf32>
    %c0_3 = arith.constant 0 : index
    %c0_4 = arith.constant 0 : index
    %c0_5 = arith.constant 0 : index
    %5 = vector.load %arg3[%c0_3, %c0_4, %c0_5] : memref<1x64x16xf32, #tpu.memory_space<vmem>>, vector<1x64x16xf32>
    %6 = vector.shape_cast %5 : vector<1x64x16xf32> to vector<64x16xf32>
    %cst = arith.constant dense<0.000000e+00> : vector<17x16xf32>
    %7 = tpu.matmul %4, %6, %cst {dimension_numbers = #tpu.dot_dimension_numbers<[1], [0], [0], [1], [0, 0, 1, 1], [], []>} : vector<17x64xf32>, vector<64x16xf32>, vector<17x16xf32> -> vector<17x16xf32>
    %c0_6 = arith.constant 0 : index
    %c0_7 = arith.constant 0 : index
    %c0_8 = arith.constant 0 : index
    %8 = vector.load %arg6[%c0_6, %c0_7, %c0_8] : memref<1x1x16xf32, #tpu.memory_space<vmem>>, vector<1x1x16xf32>
    %9 = vector.shape_cast %8 : vector<1x1x16xf32> to vector<1x16xf32>
    %10 = vector.broadcast %9 : vector<1x16xf32> to vector<17x16xf32>
    %11 = arith.addf %7, %10 : vector<17x16xf32>
    %c0_9 = arith.constant 0 : index
    %c0_10 = arith.constant 0 : index
    %c0_11 = arith.constant 0 : index
    %12 = vector.load %arg4[%c0_9, %c0_10, %c0_11] : memref<1x64x16xf32, #tpu.memory_space<vmem>>, vector<1x64x16xf32>
    %13 = vector.shape_cast %12 : vector<1x64x16xf32> to vector<64x16xf32>
    %cst_12 = arith.constant dense<0.000000e+00> : vector<17x16xf32>
    %14 = tpu.matmul %4, %13, %cst_12 {dimension_numbers = #tpu.dot_dimension_numbers<[1], [0], [0], [1], [0, 0, 1, 1], [], []>} : vector<17x64xf32>, vector<64x16xf32>, vector<17x16xf32> -> vector<17x16xf32>
    %c0_13 = arith.constant 0 : index
    %c0_14 = arith.constant 0 : index
    %c0_15 = arith.constant 0 : index
    %15 = vector.load %arg5[%c0_13, %c0_14, %c0_15] : memref<1x64x16xf32, #tpu.memory_space<vmem>>, vector<1x64x16xf32>
    %16 = vector.shape_cast %15 : vector<1x64x16xf32> to vector<64x16xf32>
    %cst_16 = arith.constant dense<0.000000e+00> : vector<17x16xf32>
    %17 = tpu.matmul %4, %16, %cst_16 {dimension_numbers = #tpu.dot_dimension_numbers<[1], [0], [0], [1], [0, 0, 1, 1], [], []>} : vector<17x64xf32>, vector<64x16xf32>, vector<17x16xf32> -> vector<17x16xf32>
    %c0_17 = arith.constant 0 : index
    %c0_18 = arith.constant 0 : index
    %c0_19 = arith.constant 0 : index
    %18 = vector.load %arg7[%c0_17, %c0_18, %c0_19] : memref<1x1x16xf32, #tpu.memory_space<vmem>>, vector<1x1x16xf32>
    %19 = vector.shape_cast %18 : vector<1x1x16xf32> to vector<1x16xf32>
    %20 = vector.broadcast %19 : vector<1x16xf32> to vector<17x16xf32>
    %21 = arith.addf %17, %20 : vector<17x16xf32>
    %cst_20 = arith.constant dense<0.000000e+00> : vector<17x17xf32>
    %22 = tpu.matmul %11, %14, %cst_20 {dimension_numbers = #tpu.dot_dimension_numbers<[1], [1], [0], [0], [0, 0, 1, 0], [], []>} : vector<17x16xf32>, vector<17x16xf32>, vector<17x17xf32> -> vector<17x17xf32>
    %c0_21 = arith.constant 0 : index
    %c0_22 = arith.constant 0 : index
    %c0_23 = arith.constant 0 : index
    %23 = vector.load %arg8[%c0_21, %c0_22, %c0_23] : memref<1x17x17xf32, #tpu.memory_space<vmem>>, vector<1x17x17xf32>
    %24 = vector.shape_cast %23 : vector<1x17x17xf32> to vector<17x17xf32>
    %25 = arith.addf %22, %24 : vector<17x17xf32>
    %cst_24 = arith.constant dense<0xFF800000> : vector<17xf32>
    %26 = vector.multi_reduction <maximumf>, %25, %cst_24 [1] : vector<17x17xf32> to vector<17xf32>
    %27 = vector.shape_cast %26 : vector<17xf32> to vector<17x1xf32>
    %28 = vector.broadcast %27 : vector<17x1xf32> to vector<17x17xf32>
    %29 = arith.subf %25, %28 : vector<17x17xf32>
    %30 = math.exp %29 : vector<17x17xf32>
    %cst_25 = arith.constant dense<0.000000e+00> : vector<17xf32>
    %31 = vector.multi_reduction <add>, %30, %cst_25 [1] : vector<17x17xf32> to vector<17xf32>
    %32 = vector.shape_cast %31 : vector<17xf32> to vector<17x1xf32>
    %33 = vector.broadcast %32 : vector<17x1xf32> to vector<17x17xf32>
    %34 = arith.divf %30, %33 : vector<17x17xf32>
    %cst_26 = arith.constant dense<0.000000e+00> : vector<17x16xf32>
    %35 = tpu.matmul %34, %21, %cst_26 {dimension_numbers = #tpu.dot_dimension_numbers<[1], [0], [0], [1], [0, 0, 1, 1], [], []>} : vector<17x17xf32>, vector<17x16xf32>, vector<17x16xf32> -> vector<17x16xf32>
    %c0_27 = arith.constant 0 : index
    %c0_28 = arith.constant 0 : index
    %36 = vector.load %arg12[%c0_27, %c0_28] : memref<17x64xf32, #tpu.memory_space<vmem>>, vector<17x64xf32>
    %c0_29 = arith.constant 0 : index
    %c0_30 = arith.constant 0 : index
    %c0_31 = arith.constant 0 : index
    %37 = vector.load %arg9[%c0_29, %c0_30, %c0_31] : memref<1x16x64xf32, #tpu.memory_space<vmem>>, vector<1x16x64xf32>
    %38 = vector.shape_cast %37 : vector<1x16x64xf32> to vector<16x64xf32>
    %cst_32 = arith.constant dense<0.000000e+00> : vector<17x64xf32>
    %39 = tpu.matmul %35, %38, %cst_32 {dimension_numbers = #tpu.dot_dimension_numbers<[1], [0], [0], [1], [0, 0, 1, 1], [], []>} : vector<17x16xf32>, vector<16x64xf32>, vector<17x64xf32> -> vector<17x64xf32>
    %40 = arith.addf %36, %39 : vector<17x64xf32>
    %c0_33 = arith.constant 0 : index
    %c0_34 = arith.constant 0 : index
    %41 = vector.load %arg12[%c0_33, %c0_34] : memref<17x64xf32, #tpu.memory_space<vmem>>, vector<17x64xf32>
    tpu.vector_store %arg12[%c0_33, %c0_34], %40 {strides = array<i32>} : memref<17x64xf32, #tpu.memory_space<vmem>>, vector<17x64xf32>,
    %c3_i32 = arith.constant 3 : i32
    %42 = arith.cmpi eq, %arg1, %c3_i32 : i32
    %43 = arith.extui %42 : i1 to i32
    %c0_i32_35 = arith.constant 0 : i32
    %44 = arith.cmpi ne, %43, %c0_i32_35 : i32
    scf.if %44 {
      %c0_36 = arith.constant 0 : index
      %c0_37 = arith.constant 0 : index
      %45 = vector.load %arg12[%c0_36, %c0_37] : memref<17x64xf32, #tpu.memory_space<vmem>>, vector<17x64xf32>
      %c0_38 = arith.constant 0 : index
      %c0_39 = arith.constant 0 : index
      %46 = vector.load %arg10[%c0_38, %c0_39] : memref<1x64xf32, #tpu.memory_space<vmem>>, vector<1x64xf32>
      %47 = vector.broadcast %46 : vector<1x64xf32> to vector<17x64xf32>
      %48 = arith.addf %45, %47 : vector<17x64xf32>
      %c0_40 = arith.constant 0 : index
      %c0_41 = arith.constant 0 : index
      %c0_42 = arith.constant 0 : index
      %49 = vector.load %arg11[%c0_40, %c0_41, %c0_42] : memref<1x17x64xf32, #tpu.memory_space<vmem>>, vector<1x17x64xf32>
      %50 = vector.shape_cast %49 : vector<1x17x64xf32> to vector<17x64xf32>
      %51 = vector.shape_cast %48 : vector<17x64xf32> to vector<1x17x64xf32>
      tpu.vector_store %arg11[%c0_40, %c0_41, %c0_42], %51 {strides = array<i32>} : memref<1x17x64xf32, #tpu.memory_space<vmem>>, vector<1x17x64xf32>,
    } else {
    }
    return
  }
  func.func @transform_0(%arg0: i32, %arg1: i32) -> (i32, i32, i32) {
    %c0_i32 = arith.constant 0 : i32
    %c0_i32_0 = arith.constant 0 : i32
    %c0_i32_1 = arith.constant 0 : i32
    return %arg0, %c0_i32, %c0_i32_0 : i32, i32, i32
  }
  func.func @transform_1(%arg0: i32, %arg1: i32) -> (i32, i32, i32) {
    %c0_i32 = arith.constant 0 : i32
    %c0_i32_0 = arith.constant 0 : i32
    %c0_i32_1 = arith.constant 0 : i32
    return %arg1, %c0_i32, %c0_i32_0 : i32, i32, i32
  }
  func.func @transform_2(%arg0: i32, %arg1: i32) -> (i32, i32, i32) {
    %c0_i32 = arith.constant 0 : i32
    %c0_i32_0 = arith.constant 0 : i32
    %c0_i32_1 = arith.constant 0 : i32
    return %arg1, %c0_i32, %c0_i32_0 : i32, i32, i32
  }
  func.func @transform_3(%arg0: i32, %arg1: i32) -> (i32, i32, i32) {
    %c0_i32 = arith.constant 0 : i32
    %c0_i32_0 = arith.constant 0 : i32
    %c0_i32_1 = arith.constant 0 : i32
    return %arg1, %c0_i32, %c0_i32_0 : i32, i32, i32
  }
  func.func @transform_4(%arg0: i32, %arg1: i32) -> (i32, i32, i32) {
    %c0_i32 = arith.constant 0 : i32
    %c0_i32_0 = arith.constant 0 : i32
    %c0_i32_1 = arith.constant 0 : i32
    return %arg1, %c0_i32, %c0_i32_0 : i32, i32, i32
  }
  func.func @transform_5(%arg0: i32, %arg1: i32) -> (i32, i32, i32) {
    %c0_i32 = arith.constant 0 : i32
    %c0_i32_0 = arith.constant 0 : i32
    %c0_i32_1 = arith.constant 0 : i32
    return %arg1, %c0_i32, %c0_i32_0 : i32, i32, i32
  }
  func.func @transform_6(%arg0: i32, %arg1: i32) -> (i32, i32, i32) {
    %c0_i32 = arith.constant 0 : i32
    %c0_i32_0 = arith.constant 0 : i32
    %c0_i32_1 = arith.constant 0 : i32
    return %arg1, %c0_i32, %c0_i32_0 : i32, i32, i32
  }
  func.func @transform_7(%arg0: i32, %arg1: i32) -> (i32, i32, i32) {
    %c0_i32 = arith.constant 0 : i32
    %c0_i32_0 = arith.constant 0 : i32
    %c0_i32_1 = arith.constant 0 : i32
    return %arg1, %c0_i32, %c0_i32_0 : i32, i32, i32
  }
  func.func @transform_8(%arg0: i32, %arg1: i32) -> (i32, i32) {
    %c0_i32 = arith.constant 0 : i32
    %c0_i32_0 = arith.constant 0 : i32
    %c0_i32_1 = arith.constant 0 : i32
    return %c0_i32, %c0_i32_0 : i32, i32
  }
  func.func @transform_9(%arg0: i32, %arg1: i32) -> (i32, i32, i32) {
    %c0_i32 = arith.constant 0 : i32
    %c0_i32_0 = arith.constant 0 : i32
    %c0_i32_1 = arith.constant 0 : i32
    return %arg0, %c0_i32, %c0_i32_0 : i32, i32, i32
  }
}

</mosaic_0001>

<bundles_post_ra>
// kernel: tpu_custom_call.1
= control target key start
LH: loop header
LB: loop body
LE: loop exit
PB: predicated region body
PF: predicated region fallthrough
CT: control target
= control target key end

     0   :  { %s1180_s30 = smov 0   ;;  %s1182_s10 = smov 0   ;;  %s1361_s0 = inlined_call_operand.vmem [shape: f32[2,17,64], index: 0, kind: input, shape index: {}]   ;;  %s1362_s1 = inlined_call_operand.vmem [shape: f32[4,64,16], index: 1, kind: input, shape index: {}]   ;;  %s1363_s2 = inlined_call_operand.vmem [shape: f32[4,64,16], index: 2, kind: input, shape index: {}]   ;;  %s1364_s3 = inlined_call_operand.vmem [shape: f32[4,64,16], index: 3, kind: input, shape index: {}]   ;;  %s1365_s4 = inlined_call_operand.vmem [shape: f32[4,1,16], index: 4, kind: input, shape index: {}]   ;;  %s1366_s5 = inlined_call_operand.vmem [shape: f32[4,1,16], index: 5, kind: input, shape index: {}]   ;;  %s1367_s6 = inlined_call_operand.vmem [shape: f32[4,17,17], index: 6, kind: input, shape index: {}]   ;;  %s1368_s7 = inlined_call_operand.vmem [shape: f32[4,16,64], index: 7, kind: input, shape index: {}]   ;;  %s1369_s8 = inlined_call_operand.vmem [shape: f32[1,64], index: 8, kind: input, shape index: {}]   ;;  %s1370_s9 = inlined_call_operand.vmem [shape: f32[2,17,64], index: 9, kind: output, shape index: {}]  }
   0x1   :  { %1372 = sst [smem:[#allocation6_spill]] %s1361_s0  ;;  %s1184_s11 = smov 0  }
   0x2   :  { %1373 = sst [smem:[#allocation7_spill]] %s1362_s1  ;;  %s1186_s12 = smov 0  }
   0x3   :  { %1374 = sst [smem:[#allocation8_spill]] %s1363_s2  ;;  %s1188_s13 = smov 0  }
   0x4 LB: > { %1375 = sst [smem:[#allocation3_spill]] %s1123_s12  ;;  %s28_s14 = sadd.s32 1, %s1119_s11  ;;  %s1127_s13 = sphi %s1188_s13, %s19_s13   ;;  %s1123_s12 = sphi %s1186_s12, %s1384_s12   ;;  %s1119_s11 = sphi %s1184_s11, %s1386_s11   ;;  %s1115_s10 = sphi %s1182_s10, %s1382_s10   ;;  %s1111_s30 = sphi %s1180_s30, %s1385_s30  }
   0x5   : > { %s31_s15 = sadd.s32 1, %s1123_s12  ;;  %p29_p0 = scmp.ge.s32.totalorder %s28_s14, 4 }
   0x6   : > { %p978_p1 = scmp.ge.s32.totalorder %s1127_s13, 1  ;;  %p365_p2 = scmp.lt.s32.totalorder %s1127_s13, 9 }
   0x7   : > { %s1388_s14 = smov (%p29_p0, %s28_s14), 0  ;;  %s1390_s15 = smov (!%p29_p0, %s31_s15), %s1123_s12 }
   0x8   : > { %1376 = sst [smem:[#allocation4_spill]] %s1388_s14  ;;  %p366_p3 = pnand %p978_p1, %p365_p2 }
   0x9   : > { %p33_p4 = scmp.ge.s32.totalorder %s1390_s15, 2  ;;  %p432_p5 = scmp.lt.s32.totalorder (!%p366_p3), %s1115_s10, 1 }
   0xa   : > { %369 = sbr.rel (%p366_p3) target bundleno = 902 (0x386), region = 56  ;;  %p437_p6 = scmp.lt.s32.totalorder (!%p366_p3), %s1111_s30, 3 }
   0xb   : > { %s1392_s15 = smov (%p33_p4, %s1390_s15), 0  ;;  %s1378_s0 = sld [smem:[#allocation6_spill]] (!%p366_p3) }
   0xc   : > { %1377 = sst [smem:[#allocation5_spill]] %s1392_s15  ;;  %p990_p7 = scmp.ne.s32.totalorder (!%p366_p3), %s1111_s30, 0 }
   0xd   : > { %s1379_s1 = sld [smem:[#allocation7_spill]] (!%p366_p3) }
   0xe   : > { %s1380_s2 = sld [smem:[#allocation8_spill]] (!%p366_p3) }
   0xf   : > { %s1394_s10 = smov (!%p432_p5, %s1115_s10), 1 }
  0x10   : > { %s1214_s16 = scalar_select %p437_p6, %s1111_s30, 3 }
  0x11   : > { %s1031_s17 = smul.u32 24, %s1394_s10 }
  0x12   : > { %s1016_s18 = sshll.u32 %s1214_s16, 6  ;;  %s457_s22 = scalar_lea.vmem %s1366_s5, %s1214_s16 }
  0x13   : > { %s1224_s24 = scalar_lea.vmem %s1378_s0, %s1031_s17  ;;  %s1229_s27 = scalar_lea.vmem %s1379_s1, %s1016_s18 }
  0x14   : > { %s1234_s15 = scalar_lea.vmem %s1380_s2, %s1016_s18  ;;  %s1239_s19 = scalar_lea.vmem %s1364_s3, %s1016_s18 }
  0x15   : > { %s1032_s23 = smul.u32 24, %s1214_s16  ;;  %s1019_s0 = sshll.u32 %s1214_s16, 4 }
  0x16   : > { %s1250_s26 = scalar_lea.vmem %s1370_s9, %s1031_s17  ;;  %s1260_s18 = scalar_lea.vmem %s1368_s7, %s1019_s0 }
  0x17   : > { %s1255_s29 = scalar_lea.vmem %s1367_s6, %s1032_s23  ;;  %476 = sbr.rel (%p990_p7) target bundleno = 32 (0x20), region = 60 }
  0x1c   : > { %vm477_vm0 = vcmask 523264   ;;  %vm480_vm1 = vcmask 516096   ;;  %v1129_v0 = vmov 0.0  }
  0x1d   : > { %478 = vst.msk [vmem:[#allocation2] sm:$0xff] %vm477_vm0, %v1129_v0 }
  0x1e   : > { %479 = vst.msk [vmem:[#allocation2 + $0x8] sm:$0xff] %vm477_vm0, %v1129_v0 }
  0x1f   : > { %481 = vst.msk [vmem:[#allocation2 + $0x10] sm:$0x1] %vm480_vm1, %v1129_v0 }
  0x20 PF: > { %v492_v1 = vld [vmem:[%s1229_s27 + $0x38] sm:$0xff]  ;;  %v491_v2 = vld [vmem:[%s1229_s27 + $0x30] sm:$0xff]  ;;  %v490_v3 = vld [vmem:[%s1229_s27 + $0x28] sm:$0xff]  ;;  %vm497_vm2 = vcmask 523264   ;;  %vm608_vm3 = vcmask 130048   ;;  %s1381_s2 = scalar_lea.vmem %s1365_s4, %s1214_s16  ;;  %vm736_vm4 = vcmask 1040384  }
  0x21   : > { %1020 = vmatpush.msra.mxu1 %v492_v1  ;;  %515 = vmatpush.msra.mxu0 %v492_v1  ;;  %v489_v4 = vld [vmem:[%s1229_s27 + $0x20] sm:$0xff]  ;;  %v488_v5 = vld [vmem:[%s1229_s27 + $0x18] sm:$0xff]  ;;  %v487_v6 = vld [vmem:[%s1229_s27 + $0x10] sm:$0xff]  ;;  %vm653_vm5 = vcmask 138240   ;;  %vm660_vm6 = vcmask 131072   ;;  %p1013_p8 = scmp.ne.s32.totalorder %s1111_s30, 3 }
  0x22   : > { %v486_v7 = vld [vmem:[%s1229_s27 + $0x8] sm:$0xff]  ;;  %v485_v8 = vld [vmem:[%s1229_s27] sm:$0xff]  ;;  %v540_v10 = vld [vmem:[%s1234_s15 + $0x38] sm:$0xff] }
  0x23   : > { %1021 = vmatpush.msra.mxu1 %v491_v2  ;;  %516 = vmatpush.msra.mxu0 %v491_v2  ;;  %v483_v9 = vld [vmem:[%s1224_s24 + $0x8] sm:$0xff]  ;;  %v482_v11 = vld [vmem:[%s1224_s24] sm:$0xff]  ;;  %v539_v12 = vld [vmem:[%s1234_s15 + $0x30] sm:$0xff] }
  0x24   : > { %v574_v13 = vld [vmem:[%s1239_s19 + $0x38] sm:$0xff]  ;;  %v538_v14 = vld [vmem:[%s1234_s15 + $0x28] sm:$0xff]  ;;  %v537_v15 = vld [vmem:[%s1234_s15 + $0x20] sm:$0xff] }
  0x25   : > { %1022 = vmatpush.msra.mxu1 %v490_v3  ;;  %517 = vmatpush.msra.mxu0 %v490_v3  ;;  %v484_v16 = vld [vmem:[%s1224_s24 + $0x10] sm:$0x1]  ;;  %v536_v17 = vld [vmem:[%s1234_s15 + $0x18] sm:$0xff]  ;;  %v534_v19 = vld [vmem:[%s1234_s15 + $0x8] sm:$0xff] }
  0x26   : > { %587 = vmatpush.msra.mxu2 %v574_v13  ;;  %v535_v18 = vld [vmem:[%s1234_s15 + $0x10] sm:$0xff]  ;;  %v533_v20 = vld [vmem:[%s1234_s15] sm:$0xff]  ;;  %v572_v22 = vld [vmem:[%s1239_s19 + $0x28] sm:$0xff] }
  0x27   : > { %1023 = vmatpush.msra.mxu1 %v489_v4  ;;  %518 = vmatpush.msra.mxu0 %v489_v4  ;;  %v573_v21 = vld [vmem:[%s1239_s19 + $0x30] sm:$0xff]  ;;  %v571_v23 = vld [vmem:[%s1239_s19 + $0x20] sm:$0xff]  ;;  %v570_v24 = vld [vmem:[%s1239_s19 + $0x18] sm:$0xff] }
  0x28   : > { %588 = vmatpush.msra.mxu2 %v573_v21  ;;  %v569_v25 = vld [vmem:[%s1239_s19 + $0x10] sm:$0xff]  ;;  %v568_v26 = vld [vmem:[%s1239_s19 + $0x8] sm:$0xff]  ;;  %v567_v27 = vld [vmem:[%s1239_s19] sm:$0xff] }
  0x29   : > { %1024 = vmatpush.msra.mxu1 %v488_v5  ;;  %519 = vmatpush.msra.mxu0 %v488_v5  ;;  %v1074_v34 = vld [vmem:[%s1381_s2] ss:$0 sm:$0xff]  ;;  %v606_v50 = vld [vmem:[%s1255_s29 + $0x8] sm:$0xff]  ;;  %v607_v51 = vld [vmem:[%s1255_s29 + $0x10] sm:$0x1] }
  0x2a   : > { %589 = vmatpush.msra.mxu2 %v572_v22  ;;  %v1075_v40 = vld [vmem:[%s457_s22] ss:$0 sm:$0xff] }
  0x2b   : > { %1025 = vmatpush.msra.mxu1 %v487_v6  ;;  %520 = vmatpush.msra.mxu0 %v487_v6  ;;  %v605_v45 = vld [vmem:[%s1255_s29] sm:$0xff] }
  0x2c   : > { %590 = vmatpush.msra.mxu2 %v571_v23 }
  0x2d   : > { %1026 = vmatpush.msra.mxu1 %v486_v7  ;;  %521 = vmatpush.msra.mxu0 %v486_v7 }
  0x2e   : > { %591 = vmatpush.msra.mxu2 %v570_v24 }
  0x2f   : > { %1027 = vmatpush.msra.mxu1 %v485_v8  ;;  %522 = vmatpush.msra.mxu0 %v485_v8 }
  0x30   : > { %992 = vmatmul.msk.f32.vlgmr.msra.gmra.mxu1 %vm497_vm2, %v483_v9  ;;  %991 = vmatmul.msk.f32.vlgmr.msra.gmra.mxu0 %vm497_vm2, %v482_v11 }
  0x31   : > { %549 = vmatpush.msrb.mxu1 %v540_v10  ;;  %592 = vmatpush.msra.mxu2 %v569_v25 }
  0x33   : > { %550 = vmatpush.msrb.mxu1 %v539_v12  ;;  %593 = vmatpush.msra.mxu2 %v568_v26 }
  0x35   : > { %551 = vmatpush.msrb.mxu1 %v538_v14  ;;  %594 = vmatpush.msra.mxu2 %v567_v27 }
  0x36   : > { %997 = vmatmul.msk.f32.vlgmr.msra.gmra.mxu2 %vm497_vm2, %v482_v11 }
  0x37   : > { %552 = vmatpush.msrb.mxu1 %v537_v15 }
  0x38   : > { %993 = vmatmul.msk.f32.gmra.mxu1 %vm497_vm2, %v484_v16 }
  0x39   : > { %553 = vmatpush.msrb.mxu1 %v536_v17 }
  0x3b   : > { %554 = vmatpush.msrb.mxu1 %v535_v18 }
  0x3d   : > { %555 = vmatpush.msrb.mxu1 %v534_v19 }
  0x3e   : > { %998 = vmatmul.msk.f32.gmra.mxu2 %vm497_vm2, %v483_v9 }
  0x3f   : > { %556 = vmatpush.msrb.mxu1 %v533_v20 }
  0x40   : > { %994 = vmatmul.msk.f32.vlgmr.msrb.gmra.mxu1 %vm497_vm2, %v482_v11 }
  0x46   : > { %999 = vmatmul.msk.f32.gmra.mxu2 %vm497_vm2, %v484_v16 }
  0x48   : > { %995 = vmatmul.msk.f32.gmra.mxu1 %vm497_vm2, %v483_v9  ;;  %v770_v9 = vld [vmem:[%s1260_s18 + $0x8] sm:$0xff] }
  0x49   : > { %794 = vmatpush.msrb.mxu0 %v770_v9 }
  0x50   : > { %996 = vmatmul.msk.f32.gmra.mxu1 %vm497_vm2, %v484_v16 }
  0xad   : > { %v527_v28 = vpop.f32.mrf.mxu1  ;;  %v524_v33 = vpop.f32.mrf.mxu0 }
  0xae   : > { %v525_v35 = vadd.f32 %v1074_v34, %v524_v33  ;;  %v528_v36 = vadd.f32 %v1074_v34, %v527_v28 }
  0xb5   : > { %v530_v29 = vpop.f32.mrf.mxu1 }
  0xb6   : > { %v531_v37 = vadd.f32 %v1074_v34, %v530_v29 }
  0xb9   : > { %v596_v38 = vpop.f32.mrf.mxu2 }
  0xba   : > { %v597_v44 = vadd.f32 %v1075_v40, %v596_v38 }
  0xbd   : > { %v558_v30 = vpop.f32.mrf.mxu1 }
  0xc1   : > { %v599_v39 = vpop.f32.mrf.mxu2 }
  0xc2   : > { %v600_v42 = vadd.f32 %v1075_v40, %v599_v39 }
  0xc5   : > { %v561_v31 = vpop.f32.mrf.mxu1 }
  0xc9   : > { %v602_v41 = vpop.f32.mrf.mxu2 }
  0xca   : > { %v603_v43 = vadd.f32 %v1075_v40, %v602_v41 }
  0xcd   : > { %v564_v32 = vpop.f32.mrf.mxu1 }
  0xce   : > { %1000 = vmatpush.xpose.msk.msrb.mxu2 %vm608_vm3, %v564_v32  ;;  %1028 = vmatpush.xpose.msk.msra.mxu3 %vm608_vm3, %v564_v32 }
  0xd2   : > { %1001 = vmatpush.xpose.msk.msrb.mxu2 %vm608_vm3, %v561_v31  ;;  %1029 = vmatpush.xpose.msk.msra.mxu3 %vm608_vm3, %v561_v31 }
  0xd6   : > { %1002 = vmatpush.xpose.msk.msrb.mxu2 %vm608_vm3, %v558_v30  ;;  %1030 = vmatpush.xpose.msk.msra.mxu3 %vm608_vm3, %v558_v30 }
  0xd9   : > { %1003 = vmatmul.msk.f32.vlgmr.msrb.gmra.mxu2 %vm608_vm3, %v525_v35  ;;  %1004 = vmatmul.msk.f32.vlgmr.msra.gmra.mxu3 %vm608_vm3, %v528_v36 }
  0xda   : > { %1006 = vmatpush.msk.msrb.mxu3 %vm736_vm4, %v603_v43 }
  0xdc   : > { %754 = vmatpush.msrb.mxu3 %v600_v42 }
  0xde   : > { %755 = vmatpush.msrb.mxu3 %v597_v44 }
  0xe1   : > { %1005 = vmatmul.msk.f32.gmra.mxu3 %vm608_vm3, %v531_v37 }
 0x15c   : > { %v644_v46 = vpop.f32.mrf.mxu2  ;;  %v647_v47 = vpop.f32.mrf.mxu3 }
 0x15d   : > { %v645_v48 = vadd.f32 %v644_v46, %v605_v45  ;;  %v648_v52 = vadd.f32 %v647_v47, %v606_v50  ;;  %v769_v45 = vld [vmem:[%s1260_s18] sm:$0xff] }
 0x15e   : > { %795 = vmatpush.msrb.mxu0 %v769_v45 }
 0x15f   : > { %v654_v49 = vsel %vm653_vm5, %v645_v48, -inf  ;;  %v657_v56 = vsel %vm653_vm5, %v648_v52, -inf }
 0x160   : > { %655 = vmax.xlane.f32.xlu0 %v654_v49  ;;  %v766_v49 = vld [vmem:[#allocation2] sm:$0xff] }
 0x164   : > { %v650_v53 = vpop.f32.mrf.mxu3 }
 0x165   : > { %v651_v54 = vadd.f32 %v650_v53, %v607_v51 }
 0x167   : > { %v661_v55 = vsel %vm660_vm6, %v651_v54, -inf }
 0x168   : > { %662 = vmax.xlane.f32.xlu1 %v661_v55  ;;  %658 = vmax.xlane.f32.xlu0 %v657_v56  ;;  %v768_v55 = vld [vmem:[#allocation2 + $0x10] sm:$0x1] }
 0x1d3   : > { %v656_v57 = vpop.xlane.xlu0 %655 }
 0x1d4   : > { %v664_v58 = vsub.f32 %v645_v48, %v656_v57 }
 0x1d6   : > { %v667_v59 = vmul.f32 1.442695, %v664_v58 }
 0x1d8   : > { %1076 = vpow2.f32 %v667_v59 }
 0x1db   : > { %v659_v60 = vpop.xlane.xlu0 %658  ;;  %v663_v61 = vpop.xlane.xlu1 %662 }
 0x1dc   : > { %v665_v62 = vsub.f32 %v648_v52, %v659_v60  ;;  %v666_v1 = vsub.f32 %v651_v54, %v663_v61  ;;  %v767_v52 = vld [vmem:[#allocation2 + $0x8] sm:$0xff] }
 0x1de   : > { %v1077_v63 = vpop.eup %1076  ;;  %v669_v0 = vmul.f32 1.442695, %v665_v62  ;;  %v671_v3 = vmul.f32 1.442695, %v666_v1 }
 0x1df   : > { %v673_v2 = vsel %vm653_vm5, %v1077_v63, 0.0 }
 0x1e0   : > { %674 = vadd.xlane.f32.xlu1 %v673_v2  ;;  %1078 = vpow2.f32 %v669_v0 }
 0x1e1   : > { %1080 = vpow2.f32 %v671_v3 }
 0x1e6   : > { %v1079_v4 = vpop.eup %1078 }
 0x1e7   : > { %v676_v5 = vsel %vm653_vm5, %v1079_v4, 0.0  ;;  %v1081_v6 = vpop.eup %1080 }
 0x1e8   : > { %677 = vadd.xlane.f32.xlu2 %v676_v5  ;;  %v679_v7 = vsel %vm660_vm6, %v1081_v6, 0.0 }
 0x1f0   : > { %680 = vadd.xlane.f32.xlu2 %v679_v7 }
 0x253   : > { %v675_v8 = vpop.xlane.xlu1 %674 }
 0x254   : > { %1082 = vrcp.f32 %v675_v8  ;;  %v693_v14 = vand.u32 2147483648, %v675_v8  ;;  %v691_v16 = vand.u32 2147483647, %v675_v8  ;;  %vm687_vm8 = vweird.f32 %v675_v8 }
 0x256   : > { %v694_v18 = vor.u32 1.1754944e-38, %v693_v14  ;;  %vm692_vm10 = vcmp.eq.f32.partialorder %v691_v16, 8.507059e+37 }
 0x25a   : > { %v1083_v10 = vpop.eup %1082 }
 0x25b   : > { %v683_v11 = vmul.f32 %v1083_v10, %v675_v8  ;;  %v678_v12 = vpop.xlane.xlu2 %677  ;;  %vm688_vm7 = vweird.f32 %v1083_v10 }
 0x25c   : > { %1084 = vrcp.f32 %v678_v12  ;;  %vm689_vm9 = vmor %vm687_vm8, %vm688_vm7  ;;  %v708_v26 = vand.u32 2147483648, %v678_v12  ;;  %v706_v28 = vand.u32 2147483647, %v678_v12  ;;  %vm702_vm12 = vweird.f32 %v678_v12 }
 0x25d   : > { %v684_v13 = vsub.f32 1.0, %v683_v11 }
 0x25e   : > { %v709_v31 = vor.u32 1.1754944e-38, %v708_v26  ;;  %vm707_vm14 = vcmp.eq.f32.partialorder %v706_v28, 8.507059e+37 }
 0x25f   : > { %v685_v15 = vmul.f32 %v1083_v10, %v684_v13 }
 0x261   : > { %v686_v17 = vadd.f32 %v1083_v10, %v685_v15 }
 0x262   : > { %v1085_v19 = vpop.eup %1084 }
 0x263   : > { %v690_v20 = vsel %vm689_vm9, %v1083_v10, %v686_v17  ;;  %v698_v21 = vmul.f32 %v1085_v19, %v678_v12  ;;  %v681_v22 = vpop.xlane.xlu2 %680  ;;  %vm703_vm11 = vweird.f32 %v1085_v19 }
 0x264   : > { %v695_v23 = vsel %vm692_vm10, %v694_v18, %v690_v20  ;;  %1086 = vrcp.f32 %v681_v22  ;;  %vm704_vm13 = vmor %vm702_vm12, %vm703_vm11  ;;  %v723_v37 = vand.u32 2147483648, %v681_v22  ;;  %v721_v39 = vand.u32 2147483647, %v681_v22 }
 0x265   : > { %v699_v24 = vsub.f32 1.0, %v698_v21  ;;  %v696_v25 = vmul.f32 %v1077_v63, %v695_v23  ;;  %vm717_vm0 = vweird.f32 %v681_v22 }
 0x266   : > { %v724_v41 = vor.u32 1.1754944e-38, %v723_v37  ;;  %vm722_vm4 = vcmp.eq.f32.partialorder %v721_v39, 8.507059e+37 }
 0x267   : > { %v700_v27 = vmul.f32 %v1085_v19, %v699_v24  ;;  %1007 = vmatmul.msk.f32.vlgmr.msrb.gmra.mxu3 %vm653_vm5, %v696_v25 }
 0x269   : > { %v701_v29 = vadd.f32 %v1085_v19, %v700_v27 }
 0x26a   : > { %v1087_v30 = vpop.eup %1086 }
 0x26b   : > { %v713_v32 = vmul.f32 %v1087_v30, %v681_v22  ;;  %v705_v33 = vsel %vm704_vm13, %v1085_v19, %v701_v29  ;;  %vm718_vm15 = vweird.f32 %v1087_v30 }
 0x26c   : > { %v710_v34 = vsel %vm707_vm14, %v709_v31, %v705_v33  ;;  %vm719_vm1 = vmor %vm717_vm0, %vm718_vm15 }
 0x26d   : > { %v714_v35 = vsub.f32 1.0, %v713_v32  ;;  %v711_v36 = vmul.f32 %v1079_v4, %v710_v34 }
 0x26f   : > { %v715_v38 = vmul.f32 %v1087_v30, %v714_v35  ;;  %1008 = vmatmul.msk.f32.gmra.mxu3 %vm653_vm5, %v711_v36 }
 0x271   : > { %v716_v40 = vadd.f32 %v1087_v30, %v715_v38 }
 0x273   : > { %v720_v42 = vsel %vm719_vm1, %v1087_v30, %v716_v40 }
 0x274   : > { %v725_v43 = vsel %vm722_vm4, %v724_v41, %v720_v42 }
 0x275   : > { %v726_v44 = vmul.f32 %v1081_v6, %v725_v43 }
 0x277   : > { %1009 = vmatmul.msk.f32.gmra.mxu3 %vm653_vm5, %v726_v44  ;;  %vm811_vm5 = vcmask 516096  }
 0x2ea   : > { %v757_v46 = vpop.f32.mrf.mxu3 }
 0x2eb   : > { %1010 = vmatmul.msk.f32.vlgmr.msrb.gmra.mxu0 %vm608_vm3, %v757_v46 }
 0x2f2   : > { %v760_v47 = vpop.f32.mrf.mxu3 }
 0x2f3   : > { %1011 = vmatmul.msk.f32.gmra.mxu0 %vm608_vm3, %v760_v47 }
 0x2fa   : > { %v763_v48 = vpop.f32.mrf.mxu3 }
 0x2fb   : > { %1012 = vmatmul.msk.f32.gmra.mxu0 %vm608_vm3, %v763_v48 }
 0x368   : > { %v797_v50 = vpop.f32.mrf.mxu0 }
 0x369   : > { %v806_v51 = vadd.f32 %v797_v50, %v766_v49 }
 0x36b   : > { %809 = vst.msk [vmem:[#allocation2] sm:$0xff] %vm497_vm2, %v806_v51 }
 0x370   : > { %v800_v53 = vpop.f32.mrf.mxu0 }
 0x371   : > { %v807_v54 = vadd.f32 %v800_v53, %v767_v52 }
 0x373   : > { %810 = vst.msk [vmem:[#allocation2 + $0x8] sm:$0xff] %vm497_vm2, %v807_v54 }
 0x377   : > { %816 = sbr.rel (%p1013_p8) target bundleno = 902 (0x386), region = 64 }
 0x378   : > { %v803_v56 = vpop.f32.mrf.mxu0 }
 0x379   : > { %v808_v57 = vadd.f32 %v803_v56, %v768_v55 }
 0x37b   : > { %812 = vst.msk [vmem:[#allocation2 + $0x10] sm:$0x1] %vm811_vm5, %v808_v57 }
 0x37c   : > { %v817_v58 = vld [vmem:[#allocation2] sm:$0xff]  ;;  %v818_v60 = vld [vmem:[#allocation2 + $0x8] sm:$0xff] }
 0x37d   : > { %v1088_v59 = vld [vmem:[%s1369_s8] ss:$0 sm:$0xff] }
 0x37e   : > { %v824_v62 = vadd.f32 %v1088_v59, %v817_v58  ;;  %v825_v63 = vadd.f32 %v1088_v59, %v818_v60 }
 0x380   : > { %827 = vst.msk [vmem:[%s1250_s26] sm:$0xff] %vm497_vm2, %v824_v62 }
 0x381   : > { %828 = vst.msk [vmem:[%s1250_s26 + $0x8] sm:$0xff] %vm497_vm2, %v825_v63 }
 0x382   : > { %v819_v61 = vld [vmem:[#allocation2 + $0x10] sm:$0x1] }
 0x383   : > { %v826_v0 = vadd.f32 %v1088_v59, %v819_v61 }
 0x385   : > { %829 = vst.msk [vmem:[%s1250_s26 + $0x10] sm:$0x1] %vm811_vm5, %v826_v0 }
 0x386 PF: > { %s19_s13 = sadd.s32 1, %s1127_s13   ;;  %s1382_s10 = sld [smem:[#allocation3_spill]] }
 0x387   : > { %p16_p9 = scmp.ge.s32.totalorder %s19_s13, 10   ;;  %s1383_s21 = sld [smem:[#allocation4_spill]] }
 0x388   : > { %s1384_s12 = sld [smem:[#allocation5_spill]]  ;;  %s1385_s30 = smov %s1119_s11 }
 0x389   :  { %18 = sbr.rel (!%p16_p9) target bundleno = 4 (0x4), region = 115 }
 0x38d   : > { %s1386_s11 = smov %s1383_s21 }

</bundles_post_ra>
